<compile_context>
chip_gen: v7x
topology: tpu7x:2x2x1
jax: 0.10.0
libtpu: 0.0.40
codegen_flags: <defaults>
</compile_context>

<pallas_src>
import functools

import jax
import jax.numpy as jnp
from jax.experimental import pallas as pl
from jax.experimental.pallas import tpu as pltpu


def _bytes(*arrs):
    return int(sum(a.size * a.dtype.itemsize for a in arrs))


@functools.lru_cache(maxsize=None)
def _vmem_budget_bytes():
    """Generation-aware scoped-VMEM budget: ~96 MiB on v5e/v6e (128 MiB VMEM),
    48 MiB on v7x (64 MiB VMEM) and as the safe fallback."""
    cap = None
    try:
        cap = int(getattr(pltpu.get_tpu_info(), "vmem_capacity_bytes", 0)) or None
    except Exception:
        cap = None
    if cap is None:
        cap = 64 * 1024 * 1024
    return min((cap * 3) // 4, 112 * 1024 * 1024)


def _tile(n, cap, align):
    """Largest block <= cap that divides n and is `align`-aligned; falls back
    to the full extent (full-extent blocks always satisfy the (8,128) rule)."""
    if n <= cap:
        return n
    t = (cap // align) * align
    while t >= align:
        if n % t == 0:
            return t
        t -= align
    return n


def _mm_tiles(M, N, K, x_item, w_item, o_item, budget, tm_cap, tn_cap, tk_cap):
    """Pick (tm, tn, tk), shrinking caps until the double-buffered working set
    fits the scoped-VMEM budget (guards _tile's full-extent fallback)."""
    while True:
        tm = _tile(M, tm_cap, 8)
        tn = _tile(N, tn_cap, 128)
        tk = _tile(K, tk_cap, 128)
        need = (2 * (tm * tk * x_item + tk * tn * w_item + tm * tn * o_item)
                + tm * tn * 4 + 2 * tn * 4)
        if need <= (budget * 3) // 4 or (
                tm_cap <= 8 and tn_cap <= 128 and tk_cap <= 128):
            return tm, tn, tk
        if tk_cap >= max(tm_cap, tn_cap) and tk_cap > 128:
            tk_cap //= 2
        elif tm_cap >= tn_cap and tm_cap > 8:
            tm_cap //= 2
        elif tn_cap > 128:
            tn_cap //= 2
        else:
            tm_cap = max(8, tm_cap // 2)


# --------------------------- generic tiled matmul ---------------------------
# out = [silu](x) @ w + b [+ residual], f32 accumulation in VMEM scratch.

def _tiled_matmul_kernel(x_ref, w_ref, b_ref, *rest, lhs_silu, has_residual):
    if has_residual:
        r_ref, o_ref, acc_ref = rest
    else:
        o_ref, acc_ref = rest

    @pl.when(pl.program_id(2) == 0)
    def _init():
        acc_ref[...] = jnp.zeros_like(acc_ref)

    x = x_ref[...]
    if lhs_silu:
        xf = x.astype(jnp.float32)
        x = (xf * jax.nn.sigmoid(xf)).astype(x_ref.dtype)
    acc_ref[...] += jnp.dot(x, w_ref[...], preferred_element_type=jnp.float32)

    @pl.when(pl.program_id(2) == pl.num_programs(2) - 1)
    def _finalize():
        out = acc_ref[...] + b_ref[...].astype(jnp.float32)
        if has_residual:
            out = out + r_ref[...].astype(jnp.float32)
        o_ref[...] = out.astype(o_ref.dtype)


def _pallas_matmul(x, w, b, residual=None, *, lhs_silu=False,
                   out_dtype=jnp.float32, tm_cap=512, tn_cap=512, tk_cap=1024):
    M, K = x.shape
    K2, N = w.shape
    assert K == K2
    budget = _vmem_budget_bytes()
    tm, tn, tk = _mm_tiles(M, N, K, x.dtype.itemsize, w.dtype.itemsize,
                           jnp.dtype(out_dtype).itemsize, budget,
                           tm_cap, tn_cap, tk_cap)
    grid = (M // tm, N // tn, K // tk)

    in_specs = [pl.BlockSpec((tm, tk), lambda i, j, k: (i, k)),
                pl.BlockSpec((tk, tn), lambda i, j, k: (k, j)),
                pl.BlockSpec((1, tn), lambda i, j, k: (0, j))]
    args = [x, w, b.reshape(1, N).astype(jnp.float32)]
    if residual is not None:
        in_specs.append(pl.BlockSpec((tm, tn), lambda i, j, k: (i, j)))
        args.append(residual)

    kern = functools.partial(_tiled_matmul_kernel, lhs_silu=lhs_silu,
                             has_residual=residual is not None)
    cost = pl.CostEstimate(
        flops=2 * M * N * K,
        transcendentals=M * K if lhs_silu else 0,
        bytes_accessed=_bytes(*args) + M * N * jnp.dtype(out_dtype).itemsize)

    return pl.pallas_call(
        kern,
        out_shape=jax.ShapeDtypeStruct((M, N), out_dtype),
        grid_spec=pltpu.PrefetchScalarGridSpec(
            num_scalar_prefetch=0,
            grid=grid,
            in_specs=in_specs,
            out_specs=pl.BlockSpec((tm, tn), lambda i, j, k: (i, j)),
            scratch_shapes=[pltpu.VMEM((tm, tn), jnp.float32)]),
        compiler_params=pltpu.CompilerParams(
            dimension_semantics=("parallel", "parallel", "arbitrary"),
            vmem_limit_bytes=budget),
        cost_estimate=cost,
    )(*args)


# ---------------- fused 3x3 conv + GroupNorm + scale/shift + SiLU ----------------

def _choose_cout_block(HW, Cin, Cout, cg, pad_rows, budget):
    """Largest Cout block (whole groups, lane-aligned) whose per-step working
    set fits the VMEM budget."""
    cands = [d for d in range(cg, Cout + 1, cg)
             if Cout % d == 0 and (d % 128 == 0 or d == Cout)]
    cands.sort(reverse=True)
    for cb in cands:
        need = ((HW + pad_rows) * Cin * 2      # flat halo slab (VMEM scratch)
                + 2 * HW * Cin * 2             # double-buffered input block
                + 2 * 9 * Cin * cb * 2         # double-buffered weight block
                + 2 * HW * cb * 2              # double-buffered output block
                + 4 * HW * cb * 4)             # f32 working values (acc/y/d/yn)
        if need <= (budget * 3) // 4:
            return cb
    return cands[-1]


def _conv3x3_gn_ss_silu_kernel(x_ref, w_ref, b_ref, g_ref, be_ref, sc_ref,
                               sh_ref, cm_ref, mf_ref, mb_ref, o_ref, xp_ref,
                               *, W, HW, PAD, eps):
    Cin = x_ref.shape[-1]
    Cb = w_ref.shape[-1]
    dt = x_ref.dtype

    # In-kernel halo (replaces the host-side jnp.pad HBM round trip): zero the
    # two pad bands of the flat slab, copy the interior (VMEM-only traffic).
    xp_ref[0:PAD, :] = jnp.zeros((PAD, Cin), dt)
    xp_ref[PAD + HW:PAD + HW + PAD, :] = jnp.zeros((PAD, Cin), dt)
    xp_ref[PAD:PAD + HW, :] = x_ref[...]

    # 3x3 conv = 9 shifted 2-D (HW, Cin) @ (Cin, Cb) MXU dots, f32 accumulate.
    # Windows are static ref slices (no reshape / patch materialization); the
    # two column masks zero the row-wrapped +-1-column taps, while row
    # over/underflow already reads the zeroed pad band.
    acc = jnp.zeros((HW, Cb), jnp.float32)
    for kh in range(3):
        for kw in range(3):
            s = (kh - 1) * W + (kw - 1)
            win = xp_ref[PAD + s:PAD + s + HW, :]
            if kw == 0:
                win = win * cm_ref[0]
            elif kw == 2:
                win = win * cm_ref[1]
            acc = acc + jnp.dot(win, w_ref[kh * 3 + kw],
                                preferred_element_type=jnp.float32)
    y = acc + b_ref[...].astype(jnp.float32)                    # (HW, Cb) f32

    # GroupNorm over this block's groups (two-pass, numerically stable).
    # Per-group reduce/broadcast via skinny (Cb, Gb)/(Gb, Cb) segment matmuls;
    # mb already folds the 1/(HW*Cg) factor.
    s1 = jnp.sum(y, axis=0, keepdims=True)
    mean = jnp.dot(jnp.dot(s1, mf_ref[...], preferred_element_type=jnp.float32),
                   mb_ref[...], preferred_element_type=jnp.float32)
    d = y - mean
    s2 = jnp.sum(d * d, axis=0, keepdims=True)
    var = jnp.dot(jnp.dot(s2, mf_ref[...], preferred_element_type=jnp.float32),
                  mb_ref[...], preferred_element_type=jnp.float32)

    yn = d * jax.lax.rsqrt(var + eps)
    yn = yn * g_ref[...].astype(jnp.float32) + be_ref[...].astype(jnp.float32)
    yn = yn * (sc_ref[...].astype(jnp.float32) + 1.0) \
        + sh_ref[...].astype(jnp.float32)                       # time-emb ss
    yn = yn * jax.nn.sigmoid(yn)                                # SiLU (f32 EUP)
    o_ref[...] = yn.astype(o_ref.dtype)


def _pallas_conv3x3_gn_ss_silu(x_flat, w_std, bias, gamma, beta, scale3,
                               shift3, groups, W, eps=1e-5):
    x_flat = x_flat.astype(jnp.bfloat16)
    B, HW, Cin = x_flat.shape
    Cout = w_std.shape[0]
    cg = Cout // groups
    PAD = ((W + 1 + 7) // 8) * 8               # halo rows, sublane-aligned
    budget = _vmem_budget_bytes()
    Cb = _choose_cout_block(HW, Cin, Cout, cg, 2 * PAD, budget)
    n_cb = Cout // Cb
    Gb = Cb // cg

    # TODO(synk): at extreme resolutions where the flat (HW, Cin) slab itself
    # overflows the per-step VMEM budget, add H-row tiling (+1-row halo via
    # manual make_async_copy) with a two-pass (stats-accumulate / normalize)
    # GroupNorm; the Cout-group-block grid below covers common UNet sizes.
    # Note: at Cout >= 128 the output store is already lane-dense; packing the
    # toy Cout<128 case was skipped (in-kernel relayout outweighs the gain).

    wm = jnp.transpose(w_std, (2, 3, 1, 0)).reshape(9, Cin, Cout)
    wm = wm.astype(jnp.bfloat16)

    col = jnp.arange(HW) % W
    cm = jnp.stack([(col >= 1), (col <= W - 2)]).astype(jnp.bfloat16)
    cm = cm.reshape(2, HW, 1)

    gidx = jnp.arange(Cb) // cg
    m_fwd = (gidx[:, None] == jnp.arange(Gb)[None, :]).astype(jnp.float32)
    m_bwd = m_fwd.T / float(HW * cg)

    kern = functools.partial(_conv3x3_gn_ss_silu_kernel, W=W, HW=HW, PAD=PAD,
                             eps=eps)
    cost = pl.CostEstimate(
        flops=2 * B * HW * 9 * Cin * Cout,
        transcendentals=B * HW * Cout,
        bytes_accessed=_bytes(x_flat, wm) + B * HW * Cout * 2)

    return pl.pallas_call(
        kern,
        out_shape=jax.ShapeDtypeStruct((B, HW, Cout), jnp.bfloat16),
        grid=(B, n_cb),
        in_specs=[
            pl.BlockSpec((None, HW, Cin), lambda b, j: (b, 0, 0)),
            pl.BlockSpec((9, Cin, Cb), lambda b, j: (0, 0, j)),
            pl.BlockSpec((1, Cb), lambda b, j: (0, j)),
            pl.BlockSpec((1, Cb), lambda b, j: (0, j)),
            pl.BlockSpec((1, Cb), lambda b, j: (0, j)),
            pl.BlockSpec((None, 1, Cb), lambda b, j: (b, 0, j)),
            pl.BlockSpec((None, 1, Cb), lambda b, j: (b, 0, j)),
            pl.BlockSpec((2, HW, 1), lambda b, j: (0, 0, 0)),
            pl.BlockSpec((Cb, Gb), lambda b, j: (0, 0)),
            pl.BlockSpec((Gb, Cb), lambda b, j: (0, 0)),
        ],
        out_specs=pl.BlockSpec((None, HW, Cb), lambda b, j: (b, 0, j)),
        scratch_shapes=[pltpu.VMEM((HW + 2 * PAD, Cin), jnp.bfloat16)],
        compiler_params=pltpu.CompilerParams(
            dimension_semantics=("parallel", "parallel"),
            vmem_limit_bytes=budget),
        cost_estimate=cost,
    )(x_flat, wm,
      bias.reshape(1, Cout).astype(jnp.float32),
      gamma.reshape(1, Cout).astype(jnp.float32),
      beta.reshape(1, Cout).astype(jnp.float32),
      scale3.astype(jnp.float32),
      shift3.astype(jnp.float32),
      cm, m_fwd, m_bwd)


# ---------------------------- JAX glue / forward ----------------------------

def _weight_standardize(w, eps=1e-5):
    # weight: (Cout, Cin, kh, kw); mean/var over (Cin, kh, kw), unbiased=False
    mean = jnp.mean(w, axis=(1, 2, 3), keepdims=True)
    var = jnp.mean((w - mean) ** 2, axis=(1, 2, 3), keepdims=True)
    return (w - mean) * jax.lax.rsqrt(var + eps)


def resnet_block_forward(x_nchw, time_emb, params, groups):
    B, Cin, H, W = x_nchw.shape
    Cout = params["w1"].shape[0]
    HW = H * W
    x_flat = jnp.transpose(x_nchw, (0, 2, 3, 1)).reshape(B, HW, Cin)
    xb = x_flat.astype(jnp.bfloat16)

    # time-embedding MLP (SiLU -> Linear).  Tile caps give a single N/K block,
    # so the fused LHS SiLU is evaluated exactly once per row block.
    te = _pallas_matmul(time_emb, params["w_mlp"].T, params["b_mlp"],
                        lhs_silu=True, out_dtype=jnp.float32,
                        tm_cap=max(8, B), tn_cap=max(128, 2 * Cout),
                        tk_cap=max(128, time_emb.shape[1]))
    scale, shift = jnp.split(te, 2, axis=1)              # each (B, Cout)
    scale3 = scale.reshape(B, 1, Cout)
    shift3 = shift.reshape(B, 1, Cout)
    zeros3 = jnp.zeros((B, 1, Cout), jnp.float32)

    # block1: WS 3x3 conv + GN + (scale+1)/shift + SiLU  (one fused kernel)
    h = _pallas_conv3x3_gn_ss_silu(xb, _weight_standardize(params["w1"]),
                                   params["b1"], params["g1"], params["be1"],
                                   scale3, shift3, groups, W)
    # block2: WS 3x3 conv + GN + SiLU (no scale/shift)
    h2 = _pallas_conv3x3_gn_ss_silu(h, _weight_standardize(params["w2"]),
                                    params["b2"], params["g2"], params["be2"],
                                    zeros3, zeros3, groups, W)

    # residual 1x1 conv fused with the final add: full-N lane-dense bf16 output
    wr = params["wr"].reshape(Cout, Cin).T.astype(jnp.bfloat16)  # (Cin, Cout)
    out_flat = _pallas_matmul(xb.reshape(B * HW, Cin), wr, params["br"],
                              residual=h2.reshape(B * HW, Cout),
                              out_dtype=jnp.bfloat16,
                              tm_cap=1024, tn_cap=max(128, Cout),
                              tk_cap=max(128, Cin))
    out = jnp.transpose(out_flat.reshape(B, H, W, Cout), (0, 3, 1, 2))
    return out.astype(jnp.float32)                        # NCHW, like PyTorch


# ---------------------------- pure-JAX reference ----------------------------

def reference_forward(x, t, params, groups):
    hi = jax.lax.Precision.HIGHEST

    def silu(v):
        return v * jax.nn.sigmoid(v)

    def conv(v, w, b, pad):
        y = jax.lax.conv_general_dilated(
            v, w, (1, 1), [(pad, pad), (pad, pad)],
            dimension_numbers=("NCHW", "OIHW", "NCHW"), precision=hi)
        return y + b[None, :, None, None]

    def gn(v, gamma, beta, G, eps=1e-5):
        B, C, H, W = v.shape
        vr = v.reshape(B, G, C // G, H, W)
        m = vr.mean(axis=(2, 3, 4), keepdims=True)
        var = ((vr - m) ** 2).mean(axis=(2, 3, 4), keepdims=True)
        vn = ((vr - m) * jax.lax.rsqrt(var + eps)).reshape(B, C, H, W)
        return vn * gamma[None, :, None, None] + beta[None, :, None, None]

    te = jnp.dot(silu(t), params["w_mlp"].T, precision=hi) + params["b_mlp"]
    scale, shift = jnp.split(te, 2, axis=1)
    h = conv(x, _weight_standardize(params["w1"]), params["b1"], 1)
    h = gn(h, params["g1"], params["be1"], groups)
    h = h * (scale[:, :, None, None] + 1.0) + shift[:, :, None, None]
    h = silu(h)
    h = conv(h, _weight_standardize(params["w2"]), params["b2"], 1)
    h = gn(h, params["g2"], params["be2"], groups)
    h = silu(h)
    res = conv(x, params["wr"], params["br"], 0)
    return h + res


def init_params(key, dim, dim_out, time_emb_dim):
    ks = jax.random.split(key, 12)
    return {
        "w_mlp": 0.10 * jax.random.normal(ks[0], (2 * dim_out, time_emb_dim), jnp.float32),
        "b_mlp": 0.10 * jax.random.normal(ks[1], (2 * dim_out,), jnp.float32),
        "w1":    0.30 * jax.random.normal(ks[2], (dim_out, dim, 3, 3), jnp.float32),
        "b1":    0.10 * jax.random.normal(ks[3], (dim_out,), jnp.float32),
        "g1":    1.0 + 0.10 * jax.random.normal(ks[4], (dim_out,), jnp.float32),
        "be1":   0.10 * jax.random.normal(ks[5], (dim_out,), jnp.float32),
        "w2":    0.30 * jax.random.normal(ks[6], (dim_out, dim_out, 3, 3), jnp.float32),
        "b2":    0.10 * jax.random.normal(ks[7], (dim_out,), jnp.float32),
        "g2":    1.0 + 0.10 * jax.random.normal(ks[8], (dim_out,), jnp.float32),
        "be2":   0.10 * jax.random.normal(ks[9], (dim_out,), jnp.float32),
        "wr":    0.30 * jax.random.normal(ks[10], (dim_out, dim, 1, 1), jnp.float32),
        "br":    0.10 * jax.random.normal(ks[11], (dim_out,), jnp.float32),
    }


if __name__ == "__main__":
    B, dim, dim_out, H, W = 2, 4, 8, 16, 16
    groups, time_emb_dim = 4, 16

    key = jax.random.PRNGKey(0)
    kx, kt, kp = jax.random.split(key, 3)
    x = jax.random.normal(kx, (B, dim, H, W), jnp.float32)        # NCHW like PyTorch
    time_emb = jax.random.normal(kt, (B, time_emb_dim), jnp.float32)
    params = init_params(kp, dim, dim_out, time_emb_dim)

    out = resnet_block_forward(x, time_emb, params, groups)
    out = jax.block_until_ready(out)

    ref = jax.block_until_ready(reference_forward(x, time_emb, params, groups))
    max_err = float(jnp.max(jnp.abs(out - ref)))
    assert out.shape == (B, dim_out, H, W), out.shape
    # bf16 activations/operands -> scale-aware tolerance
    assert bool(jnp.allclose(out, ref, atol=5e-2, rtol=5e-2)), \
        f"mismatch: max abs error {max_err}"

    print("KERNEL_OK")
</pallas_src>

<mosaic_0001>
module attributes {stable_mosaic.version = 11 : i64} {
  func.func @_tiled_matmul_kernel(%arg0: i32, %arg1: i32, %arg2: i32, %arg3: memref<2x16xf32, #tpu.memory_space<vmem>>, %arg4: memref<16x16xf32, #tpu.memory_space<vmem>>, %arg5: memref<1x16xf32, #tpu.memory_space<vmem>>, %arg6: memref<2x16xf32, #tpu.memory_space<vmem>>, %arg7: memref<2x16xf32, #tpu.memory_space<vmem>>) attributes {dimension_semantics = [#tpu.dimension_semantics<parallel>, #tpu.dimension_semantics<parallel>, #tpu.dimension_semantics<arbitrary>], iteration_bounds = array<i64: 1, 1, 1>, scalar_prefetch = 0 : i64, scratch_operands = 1 : i64, tpu.core_type = #tpu.core_type<tc>, window_params = [{transform_indices = @transform_0, window_bounds = array<i64: 2, 16>}, {transform_indices = @transform_1, window_bounds = array<i64: 16, 16>}, {transform_indices = @transform_2, window_bounds = array<i64: 1, 16>}, {transform_indices = @transform_3, window_bounds = array<i64: 2, 16>}]} {
    %c0_i32 = arith.constant 0 : i32
    %0 = arith.cmpi eq, %arg2, %c0_i32 : i32
    %1 = arith.extui %0 : i1 to i32
    %c0_i32_0 = arith.constant 0 : i32
    %2 = arith.cmpi ne, %1, %c0_i32_0 : i32
    scf.if %2 {
      %cst_11 = arith.constant 0.000000e+00 : f32
      %18 = vector.broadcast %cst_11 : f32 to vector<2x16xf32>
      %c0_12 = arith.constant 0 : index
      %c0_13 = arith.constant 0 : index
      %19 = vector.load %arg7[%c0_12, %c0_13] : memref<2x16xf32, #tpu.memory_space<vmem>>, vector<2x16xf32>
      tpu.vector_store %arg7[%c0_12, %c0_13], %18 {strides = array<i32>} : memref<2x16xf32, #tpu.memory_space<vmem>>, vector<2x16xf32>,
    } else {
    }
    %c0 = arith.constant 0 : index
    %c0_1 = arith.constant 0 : index
    %3 = vector.load %arg3[%c0, %c0_1] : memref<2x16xf32, #tpu.memory_space<vmem>>, vector<2x16xf32>
    %4 = arith.negf %3 : vector<2x16xf32>
    %5 = math.exp %4 : vector<2x16xf32>
    %cst = arith.constant 1.000000e+00 : f32
    %6 = vector.broadcast %cst : f32 to vector<2x16xf32>
    %7 = arith.addf %6, %5 : vector<2x16xf32>
    %8 = arith.divf %6, %7 : vector<2x16xf32>
    %9 = arith.mulf %3, %8 : vector<2x16xf32>
    %c0_2 = arith.constant 0 : index
    %c0_3 = arith.constant 0 : index
    %10 = vector.load %arg7[%c0_2, %c0_3] : memref<2x16xf32, #tpu.memory_space<vmem>>, vector<2x16xf32>
    %c0_4 = arith.constant 0 : index
    %c0_5 = arith.constant 0 : index
    %11 = vector.load %arg4[%c0_4, %c0_5] : memref<16x16xf32, #tpu.memory_space<vmem>>, vector<16x16xf32>
    %cst_6 = arith.constant dense<0.000000e+00> : vector<2x16xf32>
    %12 = tpu.matmul %9, %11, %cst_6 {dimension_numbers = #tpu.dot_dimension_numbers<[1], [0], [0], [1], [0, 0, 1, 1], [], []>} : vector<2x16xf32>, vector<16x16xf32>, vector<2x16xf32> -> vector<2x16xf32>
    %13 = arith.addf %10, %12 : vector<2x16xf32>
    %c0_7 = arith.constant 0 : index
    %c0_8 = arith.constant 0 : index
    %14 = vector.load %arg7[%c0_7, %c0_8] : memref<2x16xf32, #tpu.memory_space<vmem>>, vector<2x16xf32>
    tpu.vector_store %arg7[%c0_7, %c0_8], %13 {strides = array<i32>} : memref<2x16xf32, #tpu.memory_space<vmem>>, vector<2x16xf32>,
    %c0_i32_9 = arith.constant 0 : i32
    %15 = arith.cmpi eq, %arg2, %c0_i32_9 : i32
    %16 = arith.extui %15 : i1 to i32
    %c0_i32_10 = arith.constant 0 : i32
    %17 = arith.cmpi ne, %16, %c0_i32_10 : i32
    scf.if %17 {
      %c0_11 = arith.constant 0 : index
      %c0_12 = arith.constant 0 : index
      %18 = vector.load %arg7[%c0_11, %c0_12] : memref<2x16xf32, #tpu.memory_space<vmem>>, vector<2x16xf32>
      %c0_13 = arith.constant 0 : index
      %c0_14 = arith.constant 0 : index
      %19 = vector.load %arg5[%c0_13, %c0_14] : memref<1x16xf32, #tpu.memory_space<vmem>>, vector<1x16xf32>
      %20 = vector.broadcast %19 : vector<1x16xf32> to vector<2x16xf32>
      %21 = arith.addf %18, %20 : vector<2x16xf32>
      %c0_15 = arith.constant 0 : index
      %c0_16 = arith.constant 0 : index
      %22 = vector.load %arg6[%c0_15, %c0_16] : memref<2x16xf32, #tpu.memory_space<vmem>>, vector<2x16xf32>
      tpu.vector_store %arg6[%c0_15, %c0_16], %21 {strides = array<i32>} : memref<2x16xf32, #tpu.memory_space<vmem>>, vector<2x16xf32>,
    } else {
    }
    return
  }
  func.func @transform_0(%arg0: i32, %arg1: i32, %arg2: i32) -> (i32, i32) {
    %c0_i32 = arith.constant 0 : i32
    return %arg0, %arg2 : i32, i32
  }
  func.func @transform_1(%arg0: i32, %arg1: i32, %arg2: i32) -> (i32, i32) {
    %c0_i32 = arith.constant 0 : i32
    return %arg2, %arg1 : i32, i32
  }
  func.func @transform_2(%arg0: i32, %arg1: i32, %arg2: i32) -> (i32, i32) {
    %c0_i32 = arith.constant 0 : i32
    %c0_i32_0 = arith.constant 0 : i32
    return %c0_i32, %arg1 : i32, i32
  }
  func.func @transform_3(%arg0: i32, %arg1: i32, %arg2: i32) -> (i32, i32) {
    %c0_i32 = arith.constant 0 : i32
    return %arg0, %arg1 : i32, i32
  }
}

</mosaic_0001>

<bundles_post_ra>
// kernel: tpu_custom_call.1
= control target key start
LH: loop header
LB: loop body
LE: loop exit
PB: predicated region body
PF: predicated region fallthrough
CT: control target
= control target key end

     0   :  { %8 = vsyncpa [#allocation4], 0  ;;  %s341_s0 = inlined_call_operand.hbm [shape: f32[2,16], index: 0, kind: input, shape index: {}]   ;;  %s342_s1 = inlined_call_operand.hbm [shape: f32[16,16], index: 1, kind: input, shape index: {}]   ;;  %s343_s2 = inlined_call_operand.vmem [shape: f32[1,16], index: 2, kind: input, shape index: {}]   ;;  %s344_s3 = inlined_call_operand.hbm [shape: f32[2,16], index: 3, kind: output, shape index: {}]  }
   0x1   :  { %9 = vsyncpa [#allocation7], 0 }
   0x2   :  { %10 = vsyncpa [#allocation5], 0  ;;  %s264_s12 = smov [#allocation3]   ;;  %s265_s14 = smov [#allocation6]  }
   0x3   :  { %s17_s13 = sshll.u32 %s264_s12, 4  ;;  %s26_s15 = sshll.u32 %s265_s14, 4  ;;  %s18_s13 = int_to_ptr.vmem [resolvable:$true] %s17_s13  ;;  %s292_s15 = int_to_ptr.vmem [resolvable:$true] %s26_s15 }
   0x4   :  { %s192_s18 = scalar_lea.hbm %s341_s0, 32 }
   0x5   :  { %p193_p0 = scmp.ne.s32.totalorder %s341_s0, %s192_s18  ;;  %p196_p1 = scmp.lt.u32.totalorder %s192_s18, %s341_s0 }
   0x7   :  { %p198_p2 = pnand %p196_p1, %p193_p0 }
   0x9   :  { %201 = shalt.err (!%p198_p2)
}
   0xa   :  { %s202_s23 = scalar_lea.vmem %s18_s13, 32  ;;  %p207_p4 = scmp.lt.s32.totalorder %s18_s13, %s18_s13 }
   0xb   :  { %p203_p3 = scmp.ne.s32.totalorder %s18_s13, %s202_s23  ;;  %p208_p5 = scmp.lt.s32.totalorder %s202_s23, %s202_s23 }
   0xd   :  { %p209_p6 = por %p208_p5, %p207_p4 }
   0xf   :  { %p210_p7 = pnand %p209_p6, %p203_p3 }
  0x11   :  { %213 = shalt.err (!%p210_p7)
}
  0x12   :  { %20 = dma.hbm_to_vmem [thread:$0]  %s341_s0, 32, %s18_s13, [#allocation4]  }
  0x13   :  { %s214_s28 = scalar_lea.hbm %s342_s1, 256 }
  0x14   :  { %p215_p8 = scmp.ne.s32.totalorder %s342_s1, %s214_s28  ;;  %p218_p9 = scmp.lt.u32.totalorder %s214_s28, %s342_s1 }
  0x16   :  { %p220_p10 = pnand %p218_p9, %p215_p8 }
  0x18   :  { %223 = shalt.err (!%p220_p10)
}
  0x19   :  { %s224_s6 = scalar_lea.vmem %s292_s15, 256  ;;  %p229_p12 = scmp.lt.s32.totalorder %s292_s15, %s292_s15 }
  0x1a   :  { %p225_p11 = scmp.ne.s32.totalorder %s292_s15, %s224_s6  ;;  %p230_p13 = scmp.lt.s32.totalorder %s224_s6, %s224_s6 }
  0x1c   :  { %p231_p0 = por %p230_p13, %p229_p12 }
  0x1e   :  { %p232_p1 = pnand %p231_p0, %p225_p11 }
  0x20   :  { %235 = shalt.err (!%p232_p1)
}
  0x21   :  { %s266_s0 = smov 128   ;;  %s267_s7 = smov 8  }
  0x22   :  { %32 = dma.hbm_to_vmem [thread:$0]  %s342_s1, 256, %s292_s15, [#allocation7], %s266_s0, %s266_s0, %s267_s7  }
  0x23   :  { %258 = dma.done.wait [#allocation4], 32  }
  0x24   :  { %259 = vsyncadd [#allocation4], 4294967264 }
  0x25   :  { %260 = dma.done.wait [#allocation7], 256  }
  0x26   :  { %261 = vsyncadd [#allocation7], 4294967040  ;;  %vm45_vm0 = vcmask 123904   ;;  %v268_v0 = vmov 0.0|0.0   ;;  %v269_v1 = vmov 0.0   ;;  %vm270_vm1 = vmmov 0  }
  0x27   :  { %177 = vmatprep.subr.bf16.mxu0 %v268_v0  ;;  %46 = vst.msk [vmem:[#allocation2] sm:$0x3] %vm45_vm0, %v269_v1  ;;  %174 = vmatprep.mubr.msk.f32.mxu0 %vm270_vm1, %v269_v1  ;;  %v56_v2 = vld [vmem:[#allocation6] sm:$0xff]  ;;  %v57_v3 = vld [vmem:[#allocation6 + $0x8] sm:$0xff]  ;;  %v47_v4 = vld [vmem:[#allocation3] sm:$0x3] }
  0x28   :  { %v178_v5 = vpack.c.bf16 %v57_v3, %v56_v2  ;;  %v164_v6 = vmul.f32 -1.442695, %v47_v4  ;;  %vm58_vm2 = vcmask 130048   ;;  %v166_v15 = vld [vmem:[%s343_s2] ss:$0 sm:$0xff]  ;;  %s271_s11 = smov [#allocation8]  }
  0x29   :  { %s154_s12 = sshll.u32 %s271_s11, 4  ;;  %s155_s12 = int_to_ptr.vmem [resolvable:$true] %s154_s12 }
  0x2a   :  { %179 = vmatpush3.bf16.msra.mxu0 %v178_v5  ;;  %188 = vpow2.f32 %v164_v6  ;;  %s236_s13 = scalar_lea.vmem %s155_s12, 32  ;;  %p241_p3 = scmp.lt.s32.totalorder %s155_s12, %s155_s12 }
  0x2b   :  { %p237_p2 = scmp.ne.s32.totalorder %s155_s12, %s236_s13  ;;  %p242_p4 = scmp.lt.s32.totalorder %s236_s13, %s236_s13 }
  0x2d   :  { %p243_p5 = por %p242_p4, %p241_p3 }
  0x2e   :  { %v55_v11 = vld [vmem:[#allocation2] sm:$0x3] }
  0x2f   :  { %p244_p6 = pnand %p243_p5, %p237_p2 }
  0x34   :  { %v189_v7 = vpop.eup %188 }
  0x35   :  { %v51_v8 = vadd.f32 1.0, %v189_v7 }
  0x37   :  { %190 = vrcp.f32 %v51_v8 }
  0x41   :  { %v191_v9 = vpop.eup %190 }
  0x42   :  { %v54_v10 = vmul.f32 %v191_v9, %v47_v4 }
  0x44   :  { %175 = vmatmul.mubr.msk.f32.vlgmr.msra.gmra.mrb[0].mxu0 %vm58_vm2, %v54_v10 }
 0x117   :  { %v128_v12 = vpop.f32.mrb[0].mxu0 }
 0x118   :  { %v132_v13 = vadd.f32 %v128_v12, %v55_v11  ;;  %v176_v14 = vpop.f32.mrb[1].mxu0 }
 0x11a   :  { %134 = vst.msk [vmem:[#allocation2] sm:$0x3] %vm45_vm0, %v132_v13 }
 0x121   :  { %v138_v16 = vld [vmem:[#allocation2] sm:$0x3] }
 0x122   :  { %v146_v17 = vadd.f32 %v166_v15, %v138_v16 }
 0x124   :  { %147 = vst.msk [vmem:[#allocation8] sm:$0x3] %vm45_vm0, %v146_v17 }
 0x125   :  { %247 = shalt.err (!%p244_p6)
}
 0x126   :  { %s248_s16 = scalar_lea.hbm %s344_s3, 32 }
 0x127   :  { %p249_p7 = scmp.ne.s32.totalorder %s344_s3, %s248_s16  ;;  %p252_p8 = scmp.lt.u32.totalorder %s248_s16, %s344_s3 }
 0x129   :  { %p254_p9 = pnand %p252_p8, %p249_p7 }
 0x12b   :  { %257 = shalt.err (!%p254_p9)
}
 0x12c   :  { %157 = dma.vmem_to_hbm [thread:$0]  %s155_s12, 32, %s344_s3, [#allocation5]  }
 0x12d   :  { %262 = dma.done.wait [#allocation5], 32  }
 0x12e   :  { %263 = vsyncadd [#allocation5], 4294967264 }
 0x12f   :  { %161 = vsyncpa [#allocation4], 1 }
 0x130   :  { %162 = vsyncpa [#allocation7], 1 }
 0x131   :  { %163 = vsyncpa [#allocation5], 1 }

</bundles_post_ra>
